<compile_context>
chip_gen: v5e
topology: v5e:2x2
jax: 0.10.0
libtpu: 0.0.40
codegen_flags: <defaults>
</compile_context>

<pallas_src>
import jax
import jax.numpy as jnp
from jax.experimental import pallas as pl
from jax.experimental.pallas import tpu as pltpu


_SMALL_BYTES = 4 << 20        # below ~4 MiB the XLA fused transpose wins
_PER_BUF_CAP = 4 << 20        # per-buffer VMEM tile cap (5 buffers <= ~20 MiB on v7x)
_LEAD_BLOCK_TARGET = 2 << 20  # amortize grid-step overhead up to ~2 MiB per step


def _copy_kernel(x_ref, o_ref):
    # Pure block copy: input and output refs have identical shapes.
    # TODO(synk): on v5e this could bypass VMEM entirely (memory_space=pl.ANY +
    # per-tile HBM->HBM make_async_copy with a deep DMA-semaphore ring).
    o_ref[...] = x_ref[...]


def _swap_minor_kernel(x_ref, o_ref):
    # Tile-local last-two-dim transpose (XLU); handles 2-D and batched 3-D tiles.
    o_ref[...] = jnp.swapaxes(x_ref[...], -1, -2)


def _simplify(shape, perm):
    """Drop size-1 axes and merge input axes that stay adjacent & in-order in
    the output. Returns (collapsed_input_shape, collapsed_perm)."""
    keep = [d for d in range(len(shape)) if shape[d] != 1]
    remap = {d: i for i, d in enumerate(keep)}
    rshape = [shape[d] for d in keep]
    rperm = [remap[p] for p in perm if p in remap]
    if not rperm:
        return (), ()
    groups = []  # runs of consecutive input axes, in output order
    for ax in rperm:
        if groups and ax == groups[-1][-1] + 1:
            groups[-1].append(ax)
        else:
            groups.append([ax])
    order = sorted(range(len(groups)), key=lambda gi: groups[gi][0])
    cshape = []
    for gi in order:
        sz = 1
        for ax in groups[gi]:
            sz *= rshape[ax]
        cshape.append(sz)
    pos = {gi: i for i, gi in enumerate(order)}  # group -> collapsed input axis
    cperm = tuple(pos[gi] for gi in range(len(groups)))
    return tuple(cshape), cperm


def _round_down(x, m):
    return max(m, (x // m) * m)


def _vmem_capacity_bytes():
    try:
        cap = int(pltpu.get_tpu_info().vmem_capacity_bytes)
    except Exception:
        cap = 64 * 1024 * 1024  # conservative default (v7x per-TC VMEM)
    # If the query reports a chip-level figure (2 TCs on v7x), clamp so the
    # tile math never assumes more than the v5e/v6e per-TC 128 MiB.
    return min(cap, 128 * 1024 * 1024)


def _sublane_granularity(itemsize):
    # Sub-32-bit dtypes pack along sublanes: f32 -> 8, bf16/f16 -> 16, int8/fp8 -> 32.
    return max(8, 32 // max(int(itemsize), 1))


def _pick_tiles(cs, u, v, itemsize, budget_bytes):
    """Tile sizes for the output's last two dims: TR rows (second-minor), TC lanes."""
    r = len(cs)
    tile_elems = max(8 * 128, budget_bytes // itemsize)
    full_u, full_v = cs[u], cs[v]
    sub_gran = _sublane_granularity(itemsize)
    # TR is the output's second-minor dim. On the swap path (u == r-1) it is also
    # the input's lane dim -> 128 granularity; on the copy path packed-sublane gran.
    gran_u = 128 if u == r - 1 else sub_gran
    gran_v = 128  # TC is the output's lane dim: multiple of 128 unless full

    # Lane-dense output: make TC as wide as possible, reserving ~128 rows of budget.
    row_reserve = max(gran_u, min(full_u, 128))
    if full_v <= max(gran_v, tile_elems // row_reserve):
        tc = full_v
    else:
        tc = _round_down(min(full_v, tile_elems // row_reserve), gran_v)

    row_budget = max(gran_u, tile_elems // max(tc, 1))
    if full_u <= row_budget:
        tr = full_u
    else:
        tr = _round_down(min(full_u, row_budget), gran_u)
    return tr, tc


def pallas_permute(x, sizes, *, force_pallas=False):
    """Equivalent of torch.Tensor.permute(*sizes) via a tiled Pallas TPU kernel."""
    nd = x.ndim
    sizes = tuple(int(s) % nd for s in sizes)
    assert sorted(sizes) == list(range(nd)), "sizes must be a permutation of the axes"
    out_shape = tuple(x.shape[s] for s in sizes)

    cs, cp = _simplify(x.shape, sizes)
    r = len(cs)
    if r <= 1 or cp == tuple(range(r)):
        return jnp.reshape(x, out_shape)  # no real data movement

    itemsize = jnp.dtype(x.dtype).itemsize
    if not force_pallas and x.size * itemsize < _SMALL_BYTES:
        # Launch overhead dominates for small tensors; XLA fuses/elides this.
        return jnp.transpose(x, sizes)

    u, v = cp[-2], cp[-1]  # input axes that become the output's last two dims
    if (r - 1) not in (u, v):
        # Input's lane axis moves to a leading output position.
        # TODO(synk): two-pass tiled relayout (minor swap into scratch layout,
        # then lane-dense block copy) instead of falling back to XLA.
        return jnp.transpose(x, sizes)

    is_swap = u > v                    # u == r-1: input lane feeds output second-minor
    xc = jnp.reshape(x, cs)            # metadata-only in HBM
    co_shape = tuple(cs[p] for p in cp)

    vmem = _vmem_capacity_bytes()
    budget = min(vmem // 24, _PER_BUF_CAP)        # per-buffer tile budget
    tr, tc = _pick_tiles(cs, u, v, itemsize, budget)

    k = r - 2
    lead = cp[:k]                      # input axes of the leading output dims

    # Leading-axis blocking: amortize per-grid-step overhead when tiles are small,
    # but only when the kernel stays a plain (batched) copy / minor swap.
    bl, lead_blk_ax = 1, None
    tile_bytes = tr * tc * itemsize
    if k > 0 and tile_bytes < _LEAD_BLOCK_TARGET:
        L = lead[-1]
        simple = (L < v) if is_swap else (L < u)
        if simple:
            target = min(budget, _LEAD_BLOCK_TARGET)
            blk = max(1, min(cs[L], target // max(tile_bytes, 1)))
            if blk > 1:
                bl, lead_blk_ax = blk, L

    def in_index_map(*g):
        idx = [0] * r
        for i, ax in enumerate(lead):
            idx[ax] = g[i]
        idx[u] = g[k]
        idx[v] = g[k + 1]
        return tuple(idx)

    def out_index_map(*g):
        return tuple(g)

    kernel = _swap_minor_kernel if is_swap else _copy_kernel

    def run(blk, blk_ax, n_in_bufs):
        in_block = []
        for d in range(r):
            if d == u:
                in_block.append(tr)
            elif d == v:
                in_block.append(tc)
            elif d == blk_ax:
                in_block.append(blk)
            else:
                in_block.append(None)               # size-1, squeezed
        out_block = [None] * k + [tr, tc]
        if blk_ax is not None:
            out_block[k - 1] = blk
        grid = tuple(
            [pl.cdiv(cs[ax], blk) if ax == blk_ax else cs[ax] for ax in lead]
            + [pl.cdiv(cs[u], tr), pl.cdiv(cs[v], tc)])  # tc axis stays innermost

        spec_kwargs = {}
        if n_in_bufs > 2:
            spec_kwargs["pipeline_mode"] = pl.Buffered(n_in_bufs)
        in_spec = pl.BlockSpec(tuple(in_block), in_index_map, **spec_kwargs)

        block_bytes = blk * tr * tc * itemsize
        need = (n_in_bufs + 2) * block_bytes        # n_in input bufs + 2 output bufs
        vmem_limit = int(min(max(need + (4 << 20), 8 << 20), 64 << 20))

        return pl.pallas_call(
            kernel,
            out_shape=jax.ShapeDtypeStruct(co_shape, x.dtype),
            grid=grid,
            in_specs=[in_spec],
            out_specs=pl.BlockSpec(tuple(out_block), out_index_map),
            compiler_params=pltpu.CompilerParams(
                dimension_semantics=("parallel",) * len(grid),
                vmem_limit_bytes=vmem_limit,
            ),
            cost_estimate=pl.CostEstimate(
                flops=0,
                transcendentals=0,
                bytes_accessed=2 * x.size * itemsize,
            ),
        )(xc)

    block_bytes = bl * tr * tc * itemsize
    want_buf3 = is_swap and (5 * block_bytes) <= min(vmem // 2, 24 << 20)

    attempts = []
    if want_buf3:
        attempts.append((bl, lead_blk_ax, 3))
    attempts.append((bl, lead_blk_ax, 2))
    if lead_blk_ax is not None:
        attempts.append((1, None, 2))               # baseline squeezed-lead config

    out_c, last_err = None, None
    for blk, blk_ax, nbuf in attempts:
        try:
            out_c = run(blk, blk_ax, nbuf)
            break
        except Exception as e:                      # fall back to a simpler config
            last_err = e
    if out_c is None:
        raise last_err
    return jnp.reshape(out_c, out_shape)


class Reshape:
    """Mirror of the PyTorch module: stores `sizes`; forward = permute."""

    def __init__(self, sizes, force_pallas=False):
        self.sizes = tuple(sizes)
        self.force_pallas = force_pallas

    def __call__(self, x):
        return pallas_permute(x, self.sizes, force_pallas=self.force_pallas)


if __name__ == "__main__":
    key = jax.random.PRNGKey(0)
    x = jax.random.normal(key, (2, 4, 16, 16), dtype=jnp.float32)  # NCHW

    # Exercise the Pallas kernel on both common permutation directions.
    for sizes in [(0, 2, 3, 1),   # NCHW -> NHWC
                  (0, 3, 1, 2)]:  # NHWC -> NCHW
        mod = Reshape(sizes, force_pallas=True)
        out = jax.block_until_ready(mod(x))
        ref = jnp.transpose(x, sizes)
        assert out.shape == ref.shape, (out.shape, ref.shape)
        assert out.dtype == ref.dtype
        assert jnp.array_equal(out, ref), f"Pallas permute mismatch for sizes={sizes}"

    # bf16 exercises the dtype-aware sublane granularity on the same swap path.
    xb = x.astype(jnp.bfloat16)
    outb = jax.block_until_ready(Reshape((0, 2, 3, 1), force_pallas=True)(xb))
    assert jnp.array_equal(outb, jnp.transpose(xb, (0, 2, 3, 1)))

    # Default module path (tiny input -> XLA fast path) also matches.
    out_small = jax.block_until_ready(Reshape((0, 2, 3, 1))(x))
    assert jnp.array_equal(out_small, jnp.transpose(x, (0, 2, 3, 1)))

    print("KERNEL_OK")
</pallas_src>

<mosaic_0001>
module attributes {stable_mosaic.version = 11 : i64} {
  func.func @_swap_minor_kernel(%arg0: i32, %arg1: i32, %arg2: i32, %arg3: memref<2x4x256xf32, #tpu.memory_space<vmem>>, %arg4: memref<2x256x4xf32, #tpu.memory_space<vmem>>) attributes {dimension_semantics = [#tpu.dimension_semantics<parallel>, #tpu.dimension_semantics<parallel>, #tpu.dimension_semantics<parallel>], iteration_bounds = array<i64: 1, 1, 1>, scalar_prefetch = 0 : i64, scratch_operands = 0 : i64, tpu.core_type = #tpu.core_type<tc>, window_params = [{transform_indices = @transform_0, window_bounds = array<i64: 2, 4, 256>}, {transform_indices = @transform_1, window_bounds = array<i64: 2, 256, 4>}]} {
    %c0 = arith.constant 0 : index
    %c0_0 = arith.constant 0 : index
    %c0_1 = arith.constant 0 : index
    %0 = vector.load %arg3[%c0, %c0_0, %c0_1] : memref<2x4x256xf32, #tpu.memory_space<vmem>>, vector<2x4x256xf32>
    %1 = tpu.transpose %0, [0, 2, 1] : vector<2x4x256xf32> -> vector<2x256x4xf32>
    %c0_2 = arith.constant 0 : index
    %c0_3 = arith.constant 0 : index
    %c0_4 = arith.constant 0 : index
    %2 = vector.load %arg4[%c0_2, %c0_3, %c0_4] : memref<2x256x4xf32, #tpu.memory_space<vmem>>, vector<2x256x4xf32>
    tpu.vector_store %arg4[%c0_2, %c0_3, %c0_4], %1 {strides = array<i32>} : memref<2x256x4xf32, #tpu.memory_space<vmem>>, vector<2x256x4xf32>,
    return
  }
  func.func @transform_0(%arg0: i32, %arg1: i32, %arg2: i32) -> (i32, i32, i32) {
    %c0_i32 = arith.constant 0 : i32
    return %arg0, %arg2, %arg1 : i32, i32, i32
  }
  func.func @transform_1(%arg0: i32, %arg1: i32, %arg2: i32) -> (i32, i32, i32) {
    %c0_i32 = arith.constant 0 : i32
    return %arg0, %arg1, %arg2 : i32, i32, i32
  }
}

module attributes {stable_mosaic.version = 11 : i64} {
  func.func @_swap_minor_kernel(%arg0: i32, %arg1: i32, %arg2: i32, %arg3: memref<1x4x256xf32, #tpu.memory_space<vmem>>, %arg4: memref<1x256x4xf32, #tpu.memory_space<vmem>>) attributes {dimension_semantics = [#tpu.dimension_semantics<parallel>, #tpu.dimension_semantics<parallel>, #tpu.dimension_semantics<parallel>], iteration_bounds = array<i64: 2, 1, 1>, scalar_prefetch = 0 : i64, scratch_operands = 0 : i64, tpu.core_type = #tpu.core_type<tc>, window_params = [{transform_indices = @transform_0, window_bounds = array<i64: 1, 4, 256>}, {transform_indices = @transform_1, window_bounds = array<i64: 1, 256, 4>}]} {
    %c0 = arith.constant 0 : index
    %c0_0 = arith.constant 0 : index
    %c0_1 = arith.constant 0 : index
    %0 = vector.load %arg3[%c0, %c0_0, %c0_1] : memref<1x4x256xf32, #tpu.memory_space<vmem>>, vector<1x4x256xf32>
    %1 = vector.shape_cast %0 : vector<1x4x256xf32> to vector<4x256xf32>
    %2 = tpu.transpose %1, [1, 0] : vector<4x256xf32> -> vector<256x4xf32>
    %c0_2 = arith.constant 0 : index
    %c0_3 = arith.constant 0 : index
    %c0_4 = arith.constant 0 : index
    %3 = vector.load %arg4[%c0_2, %c0_3, %c0_4] : memref<1x256x4xf32, #tpu.memory_space<vmem>>, vector<1x256x4xf32>
    %4 = vector.shape_cast %3 : vector<1x256x4xf32> to vector<256x4xf32>
    %5 = vector.shape_cast %2 : vector<256x4xf32> to vector<1x256x4xf32>
    tpu.vector_store %arg4[%c0_2, %c0_3, %c0_4], %5 {strides = array<i32>} : memref<1x256x4xf32, #tpu.memory_space<vmem>>, vector<1x256x4xf32>,
    return
  }
  func.func @transform_0(%arg0: i32, %arg1: i32, %arg2: i32) -> (i32, i32, i32) {
    %c0_i32 = arith.constant 0 : i32
    return %arg0, %arg2, %arg1 : i32, i32, i32
  }
  func.func @transform_1(%arg0: i32, %arg1: i32, %arg2: i32) -> (i32, i32, i32) {
    %c0_i32 = arith.constant 0 : i32
    return %arg0, %arg1, %arg2 : i32, i32, i32
  }
}

</mosaic_0001>

<bundles_post_ra>
// kernel: tpu_custom_call.1
= control target key start
LH: loop header
LB: loop body
LE: loop exit
PB: predicated region body
PF: predicated region fallthrough
CT: control target
= control target key end

     0   :  { %6 = vsyncpa [#allocation3], 0  ;;  %s267_s9 = smov [#allocation2]   ;;  %s268_s11 = smov 128   ;;  %s539_s0 = inlined_call_operand.hbm [shape: f32[2,4,256], index: 0, kind: input, shape index: {}]   ;;  %s540_s1 = inlined_call_operand.vmem [shape: f32[2,256,4], index: 1, kind: output, shape index: {}]  }
   0x1   :  { %s11_s8 = sshll.u32 %s539_s0, 4  ;;  %s13_s10 = sshll.u32 %s267_s9, 4  ;;  %s12_s8 = int_to_ptr.hbm [resolvable:$true] %s11_s8  ;;  %s14_s10 = int_to_ptr.vmem [resolvable:$true] %s13_s10 }
   0x2   :  { %s269_s12 = smov 8  }
   0x3   :  { %19 = dma.hbm_to_vmem [thread:$0]  %s12_s8, 256, %s14_s10, [#allocation3], %s268_s11, %s268_s11, %s269_s12  }
   0x4   :  { %265 = dma.done.wait [#allocation3], 256  }
   0x5   :  { %266 = vsyncadd [#allocation3], 4294967040  ;;  %v25_v0 = vld [vmem:[#allocation2 + $0x8] sm:$0xff]  ;;  %v24_v1 = vld [vmem:[#allocation2] sm:$0xff]  ;;  %vm167_vm0 = vcmask 31744  }
   0x6   :  { %32 = vst [vmem:[#allocation1 + $0x10] ss:$2 sm:$0xff] %v25_v0 }
   0x7   :  { %28 = vst [vmem:[#allocation1] ss:$2 sm:$0xff] %v24_v1 }
   0xd   :  { %v33_v2 = vld.sshfl [vmem:[#allocation1 + $0x10] sm:$0xff pattern:$0x75316420]  ;;  %v34_v4 = vld.sshfl [vmem:[#allocation1 + $0x18] sm:$0xff pattern:$0x75316420] }
   0xe   :  { %103 = vxpose.xlu1.b32.start.end [1/1] (short) %v33_v2, 128  ;;  %v29_v3 = vld.sshfl [vmem:[#allocation1] sm:$0xff pattern:$0x75316420]  ;;  %v30_v5 = vld.sshfl [vmem:[#allocation1 + $0x8] sm:$0xff pattern:$0x75316420] }
   0xf   :  { %39 = vxpose.xlu0.b32.start.end [1/1] (short) %v29_v3, 128 }
  0x8e   :  { %135 = vxpose.xlu1.b32.start.end [1/1] (short) %v34_v4, 128 }
  0x8f   :  { %71 = vxpose.xlu0.b32.start.end [1/1] (short) %v30_v5, 128 }
  0xb2   :  { %v119_v6 = vpop.trf.xlu1 }
  0xb3   :  { %200 = vst.msk [vmem:[%s540_s1 + $0x100] sm:$0xff] %vm167_vm0, %v119_v6  ;;  %v55_v7 = vpop.trf.xlu0 }
  0xb4   :  { %168 = vst.msk [vmem:[%s540_s1] sm:$0xff] %vm167_vm0, %v55_v7 }
  0xba   :  { %v120_v8 = vpop.trf.xlu1 }
  0xbb   :  { %201 = vst.msk [vmem:[%s540_s1 + $0x108] sm:$0xff] %vm167_vm0, %v120_v8  ;;  %v56_v9 = vpop.trf.xlu0 }
  0xbc   :  { %169 = vst.msk [vmem:[%s540_s1 + $0x8] sm:$0xff] %vm167_vm0, %v56_v9 }
  0xc2   :  { %v121_v10 = vpop.trf.xlu1 }
  0xc3   :  { %202 = vst.msk [vmem:[%s540_s1 + $0x110] sm:$0xff] %vm167_vm0, %v121_v10  ;;  %v57_v11 = vpop.trf.xlu0 }
  0xc4   :  { %170 = vst.msk [vmem:[%s540_s1 + $0x10] sm:$0xff] %vm167_vm0, %v57_v11 }
  0xca   :  { %v122_v12 = vpop.trf.xlu1 }
  0xcb   :  { %203 = vst.msk [vmem:[%s540_s1 + $0x118] sm:$0xff] %vm167_vm0, %v122_v12  ;;  %v58_v13 = vpop.trf.xlu0 }
  0xcc   :  { %171 = vst.msk [vmem:[%s540_s1 + $0x18] sm:$0xff] %vm167_vm0, %v58_v13 }
  0xd2   :  { %v123_v14 = vpop.trf.xlu1 }
  0xd3   :  { %204 = vst.msk [vmem:[%s540_s1 + $0x120] sm:$0xff] %vm167_vm0, %v123_v14  ;;  %v59_v15 = vpop.trf.xlu0 }
  0xd4   :  { %172 = vst.msk [vmem:[%s540_s1 + $0x20] sm:$0xff] %vm167_vm0, %v59_v15 }
  0xda   :  { %v124_v16 = vpop.trf.xlu1 }
  0xdb   :  { %205 = vst.msk [vmem:[%s540_s1 + $0x128] sm:$0xff] %vm167_vm0, %v124_v16  ;;  %v60_v17 = vpop.trf.xlu0 }
  0xdc   :  { %173 = vst.msk [vmem:[%s540_s1 + $0x28] sm:$0xff] %vm167_vm0, %v60_v17 }
  0xe2   :  { %v125_v18 = vpop.trf.xlu1 }
  0xe3   :  { %206 = vst.msk [vmem:[%s540_s1 + $0x130] sm:$0xff] %vm167_vm0, %v125_v18  ;;  %v61_v19 = vpop.trf.xlu0 }
  0xe4   :  { %174 = vst.msk [vmem:[%s540_s1 + $0x30] sm:$0xff] %vm167_vm0, %v61_v19 }
  0xea   :  { %v126_v20 = vpop.trf.xlu1 }
  0xeb   :  { %207 = vst.msk [vmem:[%s540_s1 + $0x138] sm:$0xff] %vm167_vm0, %v126_v20  ;;  %v62_v21 = vpop.trf.xlu0 }
  0xec   :  { %175 = vst.msk [vmem:[%s540_s1 + $0x38] sm:$0xff] %vm167_vm0, %v62_v21 }
  0xf2   :  { %v127_v22 = vpop.trf.xlu1 }
  0xf3   :  { %208 = vst.msk [vmem:[%s540_s1 + $0x140] sm:$0xff] %vm167_vm0, %v127_v22  ;;  %v63_v23 = vpop.trf.xlu0 }
  0xf4   :  { %176 = vst.msk [vmem:[%s540_s1 + $0x40] sm:$0xff] %vm167_vm0, %v63_v23 }
  0xfa   :  { %v128_v24 = vpop.trf.xlu1 }
  0xfb   :  { %209 = vst.msk [vmem:[%s540_s1 + $0x148] sm:$0xff] %vm167_vm0, %v128_v24  ;;  %v64_v25 = vpop.trf.xlu0 }
  0xfc   :  { %177 = vst.msk [vmem:[%s540_s1 + $0x48] sm:$0xff] %vm167_vm0, %v64_v25 }
 0x102   :  { %v129_v26 = vpop.trf.xlu1 }
 0x103   :  { %210 = vst.msk [vmem:[%s540_s1 + $0x150] sm:$0xff] %vm167_vm0, %v129_v26  ;;  %v65_v27 = vpop.trf.xlu0 }
 0x104   :  { %178 = vst.msk [vmem:[%s540_s1 + $0x50] sm:$0xff] %vm167_vm0, %v65_v27 }
 0x10a   :  { %v130_v28 = vpop.trf.xlu1 }
 0x10b   :  { %211 = vst.msk [vmem:[%s540_s1 + $0x158] sm:$0xff] %vm167_vm0, %v130_v28  ;;  %v66_v29 = vpop.trf.xlu0 }
 0x10c   :  { %179 = vst.msk [vmem:[%s540_s1 + $0x58] sm:$0xff] %vm167_vm0, %v66_v29 }
 0x112   :  { %v131_v30 = vpop.trf.xlu1 }
 0x113   :  { %212 = vst.msk [vmem:[%s540_s1 + $0x160] sm:$0xff] %vm167_vm0, %v131_v30  ;;  %v67_v31 = vpop.trf.xlu0 }
 0x114   :  { %180 = vst.msk [vmem:[%s540_s1 + $0x60] sm:$0xff] %vm167_vm0, %v67_v31 }
 0x11a   :  { %v132_v32 = vpop.trf.xlu1 }
 0x11b   :  { %213 = vst.msk [vmem:[%s540_s1 + $0x168] sm:$0xff] %vm167_vm0, %v132_v32  ;;  %v68_v33 = vpop.trf.xlu0 }
 0x11c   :  { %181 = vst.msk [vmem:[%s540_s1 + $0x68] sm:$0xff] %vm167_vm0, %v68_v33 }
 0x122   :  { %v133_v34 = vpop.trf.xlu1 }
 0x123   :  { %214 = vst.msk [vmem:[%s540_s1 + $0x170] sm:$0xff] %vm167_vm0, %v133_v34  ;;  %v69_v35 = vpop.trf.xlu0 }
 0x124   :  { %182 = vst.msk [vmem:[%s540_s1 + $0x70] sm:$0xff] %vm167_vm0, %v69_v35 }
 0x12a   :  { %v134_v36 = vpop.trf.xlu1 }
 0x12b   :  { %215 = vst.msk [vmem:[%s540_s1 + $0x178] sm:$0xff] %vm167_vm0, %v134_v36  ;;  %v70_v37 = vpop.trf.xlu0 }
 0x12c   :  { %183 = vst.msk [vmem:[%s540_s1 + $0x78] sm:$0xff] %vm167_vm0, %v70_v37 }
 0x132   :  { %v151_v38 = vpop.trf.xlu1 }
 0x133   :  { %216 = vst.msk [vmem:[%s540_s1 + $0x180] sm:$0xff] %vm167_vm0, %v151_v38  ;;  %v87_v39 = vpop.trf.xlu0 }
 0x134   :  { %184 = vst.msk [vmem:[%s540_s1 + $0x80] sm:$0xff] %vm167_vm0, %v87_v39 }
 0x13a   :  { %v152_v40 = vpop.trf.xlu1 }
 0x13b   :  { %217 = vst.msk [vmem:[%s540_s1 + $0x188] sm:$0xff] %vm167_vm0, %v152_v40  ;;  %v88_v41 = vpop.trf.xlu0 }
 0x13c   :  { %185 = vst.msk [vmem:[%s540_s1 + $0x88] sm:$0xff] %vm167_vm0, %v88_v41 }
 0x142   :  { %v153_v42 = vpop.trf.xlu1 }
 0x143   :  { %218 = vst.msk [vmem:[%s540_s1 + $0x190] sm:$0xff] %vm167_vm0, %v153_v42  ;;  %v89_v43 = vpop.trf.xlu0 }
 0x144   :  { %186 = vst.msk [vmem:[%s540_s1 + $0x90] sm:$0xff] %vm167_vm0, %v89_v43 }
 0x14a   :  { %v154_v44 = vpop.trf.xlu1 }
 0x14b   :  { %219 = vst.msk [vmem:[%s540_s1 + $0x198] sm:$0xff] %vm167_vm0, %v154_v44  ;;  %v90_v45 = vpop.trf.xlu0 }
 0x14c   :  { %187 = vst.msk [vmem:[%s540_s1 + $0x98] sm:$0xff] %vm167_vm0, %v90_v45 }
 0x152   :  { %v155_v46 = vpop.trf.xlu1 }
 0x153   :  { %220 = vst.msk [vmem:[%s540_s1 + $0x1a0] sm:$0xff] %vm167_vm0, %v155_v46  ;;  %v91_v47 = vpop.trf.xlu0 }
 0x154   :  { %188 = vst.msk [vmem:[%s540_s1 + $0xa0] sm:$0xff] %vm167_vm0, %v91_v47 }
 0x15a   :  { %v156_v48 = vpop.trf.xlu1 }
 0x15b   :  { %221 = vst.msk [vmem:[%s540_s1 + $0x1a8] sm:$0xff] %vm167_vm0, %v156_v48  ;;  %v92_v49 = vpop.trf.xlu0 }
 0x15c   :  { %189 = vst.msk [vmem:[%s540_s1 + $0xa8] sm:$0xff] %vm167_vm0, %v92_v49 }
 0x162   :  { %v157_v50 = vpop.trf.xlu1 }
 0x163   :  { %222 = vst.msk [vmem:[%s540_s1 + $0x1b0] sm:$0xff] %vm167_vm0, %v157_v50  ;;  %v93_v51 = vpop.trf.xlu0 }
 0x164   :  { %190 = vst.msk [vmem:[%s540_s1 + $0xb0] sm:$0xff] %vm167_vm0, %v93_v51 }
 0x16a   :  { %v158_v52 = vpop.trf.xlu1 }
 0x16b   :  { %223 = vst.msk [vmem:[%s540_s1 + $0x1b8] sm:$0xff] %vm167_vm0, %v158_v52  ;;  %v94_v53 = vpop.trf.xlu0 }
 0x16c   :  { %191 = vst.msk [vmem:[%s540_s1 + $0xb8] sm:$0xff] %vm167_vm0, %v94_v53 }
 0x172   :  { %v159_v54 = vpop.trf.xlu1 }
 0x173   :  { %224 = vst.msk [vmem:[%s540_s1 + $0x1c0] sm:$0xff] %vm167_vm0, %v159_v54  ;;  %v95_v55 = vpop.trf.xlu0 }
 0x174   :  { %192 = vst.msk [vmem:[%s540_s1 + $0xc0] sm:$0xff] %vm167_vm0, %v95_v55 }
 0x17a   :  { %v160_v56 = vpop.trf.xlu1 }
 0x17b   :  { %225 = vst.msk [vmem:[%s540_s1 + $0x1c8] sm:$0xff] %vm167_vm0, %v160_v56  ;;  %v96_v57 = vpop.trf.xlu0 }
 0x17c   :  { %193 = vst.msk [vmem:[%s540_s1 + $0xc8] sm:$0xff] %vm167_vm0, %v96_v57 }
 0x182   :  { %v161_v58 = vpop.trf.xlu1 }
 0x183   :  { %226 = vst.msk [vmem:[%s540_s1 + $0x1d0] sm:$0xff] %vm167_vm0, %v161_v58  ;;  %v97_v59 = vpop.trf.xlu0 }
 0x184   :  { %194 = vst.msk [vmem:[%s540_s1 + $0xd0] sm:$0xff] %vm167_vm0, %v97_v59 }
 0x18a   :  { %v162_v60 = vpop.trf.xlu1 }
 0x18b   :  { %227 = vst.msk [vmem:[%s540_s1 + $0x1d8] sm:$0xff] %vm167_vm0, %v162_v60  ;;  %v98_v61 = vpop.trf.xlu0 }
 0x18c   :  { %195 = vst.msk [vmem:[%s540_s1 + $0xd8] sm:$0xff] %vm167_vm0, %v98_v61 }
 0x192   :  { %v163_v62 = vpop.trf.xlu1 }
 0x193   :  { %228 = vst.msk [vmem:[%s540_s1 + $0x1e0] sm:$0xff] %vm167_vm0, %v163_v62  ;;  %v99_v63 = vpop.trf.xlu0 }
 0x194   :  { %196 = vst.msk [vmem:[%s540_s1 + $0xe0] sm:$0xff] %vm167_vm0, %v99_v63 }
 0x19a   :  { %v164_v0 = vpop.trf.xlu1 }
 0x19b   :  { %229 = vst.msk [vmem:[%s540_s1 + $0x1e8] sm:$0xff] %vm167_vm0, %v164_v0  ;;  %v100_v1 = vpop.trf.xlu0 }
 0x19c   :  { %197 = vst.msk [vmem:[%s540_s1 + $0xe8] sm:$0xff] %vm167_vm0, %v100_v1 }
 0x1a2   :  { %v165_v2 = vpop.trf.xlu1 }
 0x1a3   :  { %230 = vst.msk [vmem:[%s540_s1 + $0x1f0] sm:$0xff] %vm167_vm0, %v165_v2  ;;  %v101_v3 = vpop.trf.xlu0 }
 0x1a4   :  { %198 = vst.msk [vmem:[%s540_s1 + $0xf0] sm:$0xff] %vm167_vm0, %v101_v3 }
 0x1aa   :  { %v166_v4 = vpop.trf.xlu1 }
 0x1ab   :  { %231 = vst.msk [vmem:[%s540_s1 + $0x1f8] sm:$0xff] %vm167_vm0, %v166_v4  ;;  %v102_v5 = vpop.trf.xlu0 }
 0x1ac   :  { %199 = vst.msk [vmem:[%s540_s1 + $0xf8] sm:$0xff] %vm167_vm0, %v102_v5 }
 0x1ad   :  { %236 = vsyncpa [#allocation3], 1 }

// kernel: tpu_custom_call.1
= control target key start
LH: loop header
LB: loop body
LE: loop exit
PB: predicated region body
PF: predicated region fallthrough
CT: control target
= control target key end

     0   :  { %6 = vsyncpa [#allocation3], 0  ;;  %s715_s0 = inlined_call_operand.hbm [shape: f32[2,4,256], index: 0, kind: input, shape index: {}]   ;;  %s716_s1 = inlined_call_operand.vmem [shape: f32[2,256,4], index: 1, kind: output, shape index: {}]  }
   0x1   :  { %8 = vsyncpa [#allocation3 + $0x1], 0  ;;  %s561_s6 = smov 0   ;;  %s563_s7 = smov 0  }
   0x2   :  { %s565_s8 = smov 0   ;;  %s567_s9 = smov 0  }
   0x3   :  { %s569_s10 = smov 0   ;;  %s571_s11 = smov 0  }
   0x4 LB: > { %s398_s12 = sadd.s32 4294967295, %s549_s11   ;;  %s33_s13 = sadd.s32 1, %s545_s10  ;;  %s549_s11 = sphi %s571_s11, %s14_s11   ;;  %s545_s10 = sphi %s569_s10, %s723_s10   ;;  %s541_s9 = sphi %s567_s9, %s722_s9   ;;  %s537_s8 = sphi %s565_s8, %s721_s8   ;;  %s533_s7 = sphi %s563_s7, %s720_s7   ;;  %s529_s6 = sphi %s561_s6, %s719_s6  }
   0x5   : > { %p35_p0 = scmp.ge.s32.totalorder %s33_s13, 2  ;;  %s44_s14 = sadd.s32 1, %s537_s8 }
   0x6   : > { %p51_p1 = scmp.ne.s32.totalorder %s537_s8, %s533_s7  ;;  %p52_p2 = scmp.eq.s32.totalorder %s549_s11, 0 }
   0x7   : > { %s725_s13 = smov (%p35_p0, %s33_s13), 0  ;;  %p57_p4 = scmp.ne.s32.totalorder %s533_s7, %s529_s6 }
   0x8   : > { %p597_p3 = por %p52_p2, %p51_p1  ;;  %s37_s16 = ssub.s32 %s545_s10, %s725_s13 }
   0x9   : > { %p58_p5 = scmp.eq.s32.totalorder %s398_s12, 0  ;;  %p42_p6 = scmp.eq.s32.totalorder %s37_s16, 0 }
   0xa   : > { %p419_p8 = scmp.lt.s32.totalorder %s549_s11, 2  ;;  %s111_s19 = sand.u32 1, %s537_s8  }
   0xb   : > { %p604_p7 = por %p58_p5, %p57_p4  ;;  %s411_s20 = sshll.u32 %s545_s10, 3 }
   0xc   : > { %s610_s18 = scalar_select %p42_p6, %s537_s8, %s44_s14  }
   0xd   : > { %s402_s21 = sshll.u32 %s111_s19, 3  ;;  %s124_s24 = scalar_lea.hbm %s715_s0, %s411_s20 }
   0xe   : > { %s126_s25 = sshll.u32 %s124_s24, 4  ;;  %s115_s26 = scalar_lea.vmem [#allocation2], %s402_s21  ;;  %s127_s25 = int_to_ptr.hbm [resolvable:$true] %s126_s25 }
   0xf   : > { %s128_s27 = sshll.u32 %s115_s26, 4  ;;  %p416_p9 = pnand %p419_p8, %p597_p3  ;;  %s129_s27 = int_to_ptr.vmem [resolvable:$true] %s128_s27 }
  0x10   : > { %p405_p10 = scmp.ge.s32.totalorder %s549_s11, 1  ;;  %p133_p11 = scmp.lt.s32.totalorder %s549_s11, 3 }
  0x11   : > { %s112_s28 = scalar_lea.sflag [#allocation3], %s111_s19 }
  0x12   : > { %418 = dma.hbm_to_vmem [thread:$0]  (!%p416_p9), %s127_s25, 128, %s129_s27, %s112_s28  }
  0x13   : > { %p134_p12 = pnand %p405_p10, %p133_p11 }
  0x14   : > { %s139_s29 = sand.u32 (!%p134_p12), 1, %s533_s7  }
  0x15   : > { %137 = sbr.rel (%p134_p12) target bundleno = 450 (0x1c2), region = 24  ;;  %s406_s30 = sshll.u32 (!%p134_p12), %s139_s29, 3 }
  0x16   : > { %s140_s2 = scalar_lea.sflag (!%p134_p12), [#allocation3], %s139_s29  ;;  %s143_s3 = scalar_lea.vmem (!%p134_p12), [#allocation2], %s406_s30 }
  0x1a   : > { %524 = dma.done.wait (%p604_p7), %s140_s2, 128  }
  0x1b   : > { %526 = vsyncadd (%p604_p7), %s140_s2, 4294967168  ;;  %v184_v0 = vld [vmem:[%s143_s3] sm:$0xff]  ;;  %p172_p13 = scmp.lt.s32.totalorder %s541_s9, 1  ;;  %vm255_vm0 = vcmask 31744  }
  0x1c   : > { %186 = vst [vmem:[#allocation1] ss:$2 sm:$0xff] %v184_v0 }
  0x1d   : > { %s727_s9 = smov (!%p172_p13, %s541_s9), 1 }
  0x1e   : > { %s412_s4 = sshll.u32 %s727_s9, 8 }
  0x1f   : > { %s631_s12 = scalar_lea.vmem %s716_s1, %s412_s4 }
  0x23   : > { %v187_v1 = vld.sshfl [vmem:[#allocation1] sm:$0xff pattern:$0x75316420]  ;;  %v188_v2 = vld.sshfl [vmem:[#allocation1 + $0x8] sm:$0xff pattern:$0x75316420] }
  0x24   : > { %191 = vxpose.xlu0.b32.start.end [1/1] (short) %v187_v1, 128 }
  0xa4   : > { %223 = vxpose.xlu0.b32.start.end [1/1] (short) %v188_v2, 128 }
  0xc8   : > { %v207_v3 = vpop.trf.xlu0 }
  0xc9   : > { %256 = vst.msk [vmem:[%s631_s12] sm:$0xff] %vm255_vm0, %v207_v3 }
  0xd0   : > { %v208_v4 = vpop.trf.xlu0 }
  0xd1   : > { %257 = vst.msk [vmem:[%s631_s12 + $0x8] sm:$0xff] %vm255_vm0, %v208_v4 }
  0xd8   : > { %v209_v5 = vpop.trf.xlu0 }
  0xd9   : > { %258 = vst.msk [vmem:[%s631_s12 + $0x10] sm:$0xff] %vm255_vm0, %v209_v5 }
  0xe0   : > { %v210_v6 = vpop.trf.xlu0 }
  0xe1   : > { %259 = vst.msk [vmem:[%s631_s12 + $0x18] sm:$0xff] %vm255_vm0, %v210_v6 }
  0xe8   : > { %v211_v7 = vpop.trf.xlu0 }
  0xe9   : > { %260 = vst.msk [vmem:[%s631_s12 + $0x20] sm:$0xff] %vm255_vm0, %v211_v7 }
  0xf0   : > { %v212_v8 = vpop.trf.xlu0 }
  0xf1   : > { %261 = vst.msk [vmem:[%s631_s12 + $0x28] sm:$0xff] %vm255_vm0, %v212_v8 }
  0xf8   : > { %v213_v9 = vpop.trf.xlu0 }
  0xf9   : > { %262 = vst.msk [vmem:[%s631_s12 + $0x30] sm:$0xff] %vm255_vm0, %v213_v9 }
 0x100   : > { %v214_v10 = vpop.trf.xlu0 }
 0x101   : > { %263 = vst.msk [vmem:[%s631_s12 + $0x38] sm:$0xff] %vm255_vm0, %v214_v10 }
 0x108   : > { %v215_v11 = vpop.trf.xlu0 }
 0x109   : > { %264 = vst.msk [vmem:[%s631_s12 + $0x40] sm:$0xff] %vm255_vm0, %v215_v11 }
 0x110   : > { %v216_v12 = vpop.trf.xlu0 }
 0x111   : > { %265 = vst.msk [vmem:[%s631_s12 + $0x48] sm:$0xff] %vm255_vm0, %v216_v12 }
 0x118   : > { %v217_v13 = vpop.trf.xlu0 }
 0x119   : > { %266 = vst.msk [vmem:[%s631_s12 + $0x50] sm:$0xff] %vm255_vm0, %v217_v13 }
 0x120   : > { %v218_v14 = vpop.trf.xlu0 }
 0x121   : > { %267 = vst.msk [vmem:[%s631_s12 + $0x58] sm:$0xff] %vm255_vm0, %v218_v14 }
 0x128   : > { %v219_v15 = vpop.trf.xlu0 }
 0x129   : > { %268 = vst.msk [vmem:[%s631_s12 + $0x60] sm:$0xff] %vm255_vm0, %v219_v15 }
 0x130   : > { %v220_v16 = vpop.trf.xlu0 }
 0x131   : > { %269 = vst.msk [vmem:[%s631_s12 + $0x68] sm:$0xff] %vm255_vm0, %v220_v16 }
 0x138   : > { %v221_v17 = vpop.trf.xlu0 }
 0x139   : > { %270 = vst.msk [vmem:[%s631_s12 + $0x70] sm:$0xff] %vm255_vm0, %v221_v17 }
 0x140   : > { %v222_v18 = vpop.trf.xlu0 }
 0x141   : > { %271 = vst.msk [vmem:[%s631_s12 + $0x78] sm:$0xff] %vm255_vm0, %v222_v18 }
 0x148   : > { %v239_v19 = vpop.trf.xlu0 }
 0x149   : > { %272 = vst.msk [vmem:[%s631_s12 + $0x80] sm:$0xff] %vm255_vm0, %v239_v19 }
 0x150   : > { %v240_v20 = vpop.trf.xlu0 }
 0x151   : > { %273 = vst.msk [vmem:[%s631_s12 + $0x88] sm:$0xff] %vm255_vm0, %v240_v20 }
 0x158   : > { %v241_v21 = vpop.trf.xlu0 }
 0x159   : > { %274 = vst.msk [vmem:[%s631_s12 + $0x90] sm:$0xff] %vm255_vm0, %v241_v21 }
 0x160   : > { %v242_v22 = vpop.trf.xlu0 }
 0x161   : > { %275 = vst.msk [vmem:[%s631_s12 + $0x98] sm:$0xff] %vm255_vm0, %v242_v22 }
 0x168   : > { %v243_v23 = vpop.trf.xlu0 }
 0x169   : > { %276 = vst.msk [vmem:[%s631_s12 + $0xa0] sm:$0xff] %vm255_vm0, %v243_v23 }
 0x170   : > { %v244_v24 = vpop.trf.xlu0 }
 0x171   : > { %277 = vst.msk [vmem:[%s631_s12 + $0xa8] sm:$0xff] %vm255_vm0, %v244_v24 }
 0x178   : > { %v245_v25 = vpop.trf.xlu0 }
 0x179   : > { %278 = vst.msk [vmem:[%s631_s12 + $0xb0] sm:$0xff] %vm255_vm0, %v245_v25 }
 0x180   : > { %v246_v26 = vpop.trf.xlu0 }
 0x181   : > { %279 = vst.msk [vmem:[%s631_s12 + $0xb8] sm:$0xff] %vm255_vm0, %v246_v26 }
 0x188   : > { %v247_v27 = vpop.trf.xlu0 }
 0x189   : > { %280 = vst.msk [vmem:[%s631_s12 + $0xc0] sm:$0xff] %vm255_vm0, %v247_v27 }
 0x190   : > { %v248_v28 = vpop.trf.xlu0 }
 0x191   : > { %281 = vst.msk [vmem:[%s631_s12 + $0xc8] sm:$0xff] %vm255_vm0, %v248_v28 }
 0x198   : > { %v249_v29 = vpop.trf.xlu0 }
 0x199   : > { %282 = vst.msk [vmem:[%s631_s12 + $0xd0] sm:$0xff] %vm255_vm0, %v249_v29 }
 0x1a0   : > { %v250_v30 = vpop.trf.xlu0 }
 0x1a1   : > { %283 = vst.msk [vmem:[%s631_s12 + $0xd8] sm:$0xff] %vm255_vm0, %v250_v30 }
 0x1a8   : > { %v251_v31 = vpop.trf.xlu0 }
 0x1a9   : > { %284 = vst.msk [vmem:[%s631_s12 + $0xe0] sm:$0xff] %vm255_vm0, %v251_v31 }
 0x1b0   : > { %v252_v32 = vpop.trf.xlu0 }
 0x1b1   : > { %285 = vst.msk [vmem:[%s631_s12 + $0xe8] sm:$0xff] %vm255_vm0, %v252_v32 }
 0x1b8   : > { %v253_v33 = vpop.trf.xlu0 }
 0x1b9   : > { %286 = vst.msk [vmem:[%s631_s12 + $0xf0] sm:$0xff] %vm255_vm0, %v253_v33 }
 0x1c0   : > { %v254_v34 = vpop.trf.xlu0 }
 0x1c1   : > { %287 = vst.msk [vmem:[%s631_s12 + $0xf8] sm:$0xff] %vm255_vm0, %v254_v34 }
 0x1c2 PF: > { %s14_s11 = sadd.s32 1, %s549_s11   ;;  %s719_s6 = smov %s533_s7 }
 0x1c3   : > { %p11_p0 = scmp.ge.s32.totalorder %s14_s11, 4   ;;  %s720_s7 = smov %s537_s8 }
 0x1c4   : > { %s721_s8 = smov %s610_s18  ;;  %s722_s9 = smov %s545_s10 }
 0x1c5   : > { %s723_s10 = smov %s725_s13  ;;  %13 = sbr.rel (!%p11_p0) target bundleno = 4 (0x4), region = 64 }
 0x1ca   :  { %324 = vsyncpa [#allocation3], 1 }
 0x1cb   :  { %326 = vsyncpa [#allocation3 + $0x1], 1 }

</bundles_post_ra>
